<compile_context>
chip_gen: v7x
topology: tpu7x:2x2x1
jax: 0.10.0
libtpu: 0.0.40
codegen_flags: <defaults>
</compile_context>

<pallas_src>
from functools import partial

import jax
import jax.numpy as jnp
from jax import lax
from jax.experimental import pallas as pl
from jax.experimental.pallas import tpu as pltpu


def _cdiv(a, b):
    return (a + b - 1) // b


def _round_up(a, b):
    return _cdiv(a, b) * b


def _sublane_multiple(dtype):
    # Packed sublane tile: 8 for 4-byte, 16 for 2-byte, 32 for 1-byte dtypes.
    return {1: 32, 2: 16, 4: 8}.get(jnp.dtype(dtype).itemsize, 8)


def _vmem_capacity_bytes():
    try:
        return int(pltpu.get_tpu_info().vmem_capacity_bytes)
    except Exception:
        return 64 << 20  # conservative fallback: v7x per-TensorCore VMEM


def _block_vmem_bytes(br, bc, sub, itemsize):
    # Physical VMEM footprint of a (br, bc) block, including lane/sublane padding.
    return _round_up(max(br, 1), sub) * _round_up(max(bc, 1), 128) * itemsize


def _gap_single_kernel(x_ref, o_ref, *, inv_hw):
    # One block covers the whole HW extent: sum, scale once, cast, store.
    s = jnp.sum(x_ref[...].astype(jnp.float32), axis=-1, keepdims=True)
    o_ref[...] = (s * inv_hw).astype(o_ref.dtype)


def _gap_tiled_kernel(x_ref, o_ref, acc_ref, *, inv_hw, bc, hw):
    # x_ref  : (br, bc) tile of the flattened (rows, HW) input, bc % 128 == 0
    # o_ref  : (br, 1)  per-row mean (resident across the k axis)
    # acc_ref: (br, 128) f32 running per-lane partial sums
    k = pl.program_id(1)

    @pl.when(k == 0)
    def _init():
        acc_ref[...] = jnp.zeros_like(acc_ref)

    br = acc_ref.shape[0]
    needs_mask = (hw % bc) != 0  # static: only then can a block read OOB columns
    if needs_mask:
        lane = lax.broadcasted_iota(jnp.int32, (br, 128), 1)

    # Accumulate 128-lane-wide slices with pure VPU adds (no per-step XLU reduce).
    acc = acc_ref[...]
    for j in range(bc // 128):
        chunk = x_ref[:, j * 128:(j + 1) * 128].astype(jnp.float32)
        if needs_mask:
            # Global column of this slice's lane 0 is k*bc + j*128; columns >= HW
            # are out-of-bounds garbage and must contribute 0 to the sum.
            limit = (hw - j * 128) - k * bc
            chunk = jnp.where(lane < limit, chunk, 0.0)
        acc = acc + chunk
    acc_ref[...] = acc

    @pl.when(k == pl.num_programs(1) - 1)
    def _finalize():
        s = jnp.sum(acc_ref[...], axis=-1, keepdims=True)
        o_ref[...] = (s * inv_hw).astype(o_ref.dtype)


def global_avg_pool2d(x, *, target_block_bytes=8 << 20):
    """x: (N, C, H, W) -> (N, C), mean over the spatial dims (PyTorch semantics)."""
    N, C, H, W = x.shape
    HW = H * W
    rows = N * C
    dtype = x.dtype
    itemsize = jnp.dtype(dtype).itemsize
    sub = _sublane_multiple(dtype)
    inv_hw = 1.0 / float(HW)

    xr = x.reshape(rows, HW)  # contiguous view; no copy, no padding

    # Generation-aware VMEM budget (~75% of physical per-core VMEM).
    vmem_budget = (_vmem_capacity_bytes() * 3) // 4
    # Input blocks are double-buffered by the pipeline; keep 2*block well inside it.
    block_bytes = min(int(target_block_bytes), max(vmem_budget // 3, 1 << 20))

    # ---- column (HW) blocking ----
    if _block_vmem_bytes(sub, HW, sub, itemsize) <= block_bytes:
        bc = HW  # whole HW in one block -> no reduction axis, no masking
    else:
        # Multiple of 128; cap at 32 lane-slices so the in-kernel unrolled
        # accumulation loop stays short, and leave budget for tall row blocks.
        bc_budget = (block_bytes // (sub * itemsize)) // 128 * 128
        bc = int(max(128, min(bc_budget, 32 * 128)))
        bc = min(bc, _round_up(HW, 128))
    num_k = _cdiv(HW, bc)
    bc_pad = _round_up(bc, 128)

    # ---- row blocking ----
    if rows <= sub:
        br = rows  # full-dim row block (exempt from sublane alignment)
    else:
        br = max(sub, (block_bytes // (bc_pad * itemsize)) // sub * sub)
        br = min(br, _round_up(rows, sub))
        # Megacore (v7x): make sure the "parallel" rows axis has >= 2 tiles.
        if _cdiv(rows, br) < 2:
            br = min(br, _round_up(_cdiv(rows, 2), sub))
    num_row_tiles = _cdiv(rows, br)

    blk = _block_vmem_bytes(br, bc, sub, itemsize)
    acc_bytes = _round_up(br, 8) * 128 * 4 if num_k > 1 else 0
    needed = 2 * blk + acc_bytes + (2 << 20)
    vmem_limit = int(min(vmem_budget, max(needed, 16 << 20)))

    out_shape = jax.ShapeDtypeStruct((rows, 1), dtype)

    if num_k == 1 and bc == HW:
        out = pl.pallas_call(
            partial(_gap_single_kernel, inv_hw=inv_hw),
            out_shape=out_shape,
            grid=(num_row_tiles,),
            in_specs=[pl.BlockSpec((br, HW), lambda i: (i, 0))],
            out_specs=pl.BlockSpec((br, 1), lambda i: (i, 0)),
            compiler_params=pltpu.CompilerParams(
                dimension_semantics=("parallel",),
                vmem_limit_bytes=vmem_limit,
            ),
        )(xr)
    else:
        out = pl.pallas_call(
            partial(_gap_tiled_kernel, inv_hw=inv_hw, bc=bc, hw=HW),
            out_shape=out_shape,
            grid=(num_row_tiles, num_k),
            in_specs=[pl.BlockSpec((br, bc), lambda i, k: (i, k))],
            out_specs=pl.BlockSpec((br, 1), lambda i, k: (i, 0)),
            scratch_shapes=[pltpu.VMEM((br, 128), jnp.float32)],
            compiler_params=pltpu.CompilerParams(
                dimension_semantics=("parallel", "arbitrary"),
                vmem_limit_bytes=vmem_limit,
            ),
        )(xr)

    return out[:, 0].reshape(N, C)


if __name__ == "__main__":
    key = jax.random.PRNGKey(0)
    k1, k2 = jax.random.split(key)

    # Shape implied by the module's forward: NCHW.
    x = jax.random.normal(k1, (2, 4, 16, 16), dtype=jnp.float32)
    y = jax.block_until_ready(global_avg_pool2d(x))
    y_ref = jnp.mean(x.reshape(2, 4, -1), axis=2)
    assert y.shape == (2, 4), y.shape
    assert jnp.allclose(y, y_ref, atol=1e-5, rtol=1e-5), float(
        jnp.max(jnp.abs(y - y_ref))
    )

    # Also exercise the tiled / tail-masked path (HW not a multiple of 128,
    # tiny forced block budget) to keep both code paths tested.
    x2 = jax.random.normal(k2, (2, 4, 11, 13), dtype=jnp.float32)
    y2 = jax.block_until_ready(global_avg_pool2d(x2, target_block_bytes=2048))
    y2_ref = jnp.mean(x2.reshape(2, 4, -1), axis=2)
    assert jnp.allclose(y2, y2_ref, atol=1e-5, rtol=1e-5), float(
        jnp.max(jnp.abs(y2 - y2_ref))
    )

    print("KERNEL_OK")
</pallas_src>

<mosaic_0001>
module attributes {stable_mosaic.version = 11 : i64} {
  func.func @_gap_single_kernel(%arg0: i32, %arg1: memref<8x256xf32, #tpu.memory_space<vmem>>, %arg2: memref<8x1xf32, #tpu.memory_space<vmem>>) attributes {dimension_semantics = [#tpu.dimension_semantics<parallel>], iteration_bounds = array<i64: 1>, scalar_prefetch = 0 : i64, scratch_operands = 0 : i64, tpu.core_type = #tpu.core_type<tc>, window_params = [{transform_indices = @transform_0, window_bounds = array<i64: 8, 256>}, {transform_indices = @transform_1, window_bounds = array<i64: 8, 1>}]} {
    %c0 = arith.constant 0 : index
    %c0_0 = arith.constant 0 : index
    %0 = vector.load %arg1[%c0, %c0_0] : memref<8x256xf32, #tpu.memory_space<vmem>>, vector<8x256xf32>
    %cst = arith.constant dense<0.000000e+00> : vector<8xf32>
    %1 = vector.multi_reduction <add>, %0, %cst [1] : vector<8x256xf32> to vector<8xf32>
    %2 = vector.shape_cast %1 : vector<8xf32> to vector<8x1xf32>
    %cst_1 = arith.constant 3.906250e-03 : f32
    %3 = vector.broadcast %cst_1 : f32 to vector<8x1xf32>
    %4 = arith.mulf %2, %3 : vector<8x1xf32>
    %c0_2 = arith.constant 0 : index
    %c0_3 = arith.constant 0 : index
    %5 = vector.load %arg2[%c0_2, %c0_3] : memref<8x1xf32, #tpu.memory_space<vmem>>, vector<8x1xf32>
    tpu.vector_store %arg2[%c0_2, %c0_3], %4 {strides = array<i32>} : memref<8x1xf32, #tpu.memory_space<vmem>>, vector<8x1xf32>,
    return
  }
  func.func @transform_0(%arg0: i32) -> (i32, i32) {
    %c0_i32 = arith.constant 0 : i32
    %c0_i32_0 = arith.constant 0 : i32
    return %arg0, %c0_i32 : i32, i32
  }
  func.func @transform_1(%arg0: i32) -> (i32, i32) {
    %c0_i32 = arith.constant 0 : i32
    %c0_i32_0 = arith.constant 0 : i32
    return %arg0, %c0_i32 : i32, i32
  }
}

</mosaic_0001>

<bundles_post_ra>
// kernel: tpu_custom_call.1
= control target key start
LH: loop header
LB: loop body
LE: loop exit
PB: predicated region body
PF: predicated region fallthrough
CT: control target
= control target key end

     0   :  { %6 = vsyncpa [#allocation3], 0  ;;  %s58_s6 = smov [#allocation2]   ;;  %s84_s0 = inlined_call_operand.hbm [shape: f32[8,256], index: 0, kind: input, shape index: {}]   ;;  %s85_s1 = inlined_call_operand.vmem [shape: f32[8,1], index: 1, kind: output, shape index: {}]  }
   0x1   :  { %s13_s7 = sshll.u32 %s58_s6, 4  ;;  %s34_s10 = scalar_lea.hbm %s84_s0, 256  ;;  %s14_s7 = int_to_ptr.vmem [resolvable:$true] %s13_s7 }
   0x2   :  { %p35_p0 = scmp.ne.s32.totalorder %s84_s0, %s34_s10  ;;  %p38_p1 = scmp.lt.u32.totalorder %s34_s10, %s84_s0 }
   0x4   :  { %p40_p2 = pnand %p38_p1, %p35_p0 }
   0x6   :  { %43 = shalt.err (!%p40_p2)
}
   0x7   :  { %s44_s15 = scalar_lea.vmem %s14_s7, 256  ;;  %p49_p4 = scmp.lt.s32.totalorder %s14_s7, %s14_s7 }
   0x8   :  { %p45_p3 = scmp.ne.s32.totalorder %s14_s7, %s44_s15  ;;  %p50_p5 = scmp.lt.s32.totalorder %s44_s15, %s44_s15 }
   0xa   :  { %p51_p6 = por %p50_p5, %p49_p4 }
   0xc   :  { %p52_p7 = pnand %p51_p6, %p45_p3 }
   0xe   :  { %55 = shalt.err (!%p52_p7)
}
   0xf   :  { %16 = dma.hbm_to_vmem [thread:$0]  %s84_s0, 256, %s14_s7, [#allocation3]  }
  0x10   :  { %56 = dma.done.wait [#allocation3], 256  }
  0x11   :  { %57 = vsyncadd [#allocation3], 4294967040  ;;  %v20_v0 = vld [vmem:[#allocation2] sm:$0xff]  ;;  %v21_v1 = vld [vmem:[#allocation2 + $0x8] sm:$0xff]  ;;  %vm26_vm0 = vcmask 7168  }
  0x12   :  { %v22_v2 = vadd.f32 %v21_v1, %v20_v0 }
  0x14   :  { %23 = vadd.xlane.f32.xlu0 %v22_v2 }
  0xa1   :  { %v24_v3 = vpop.xlane.xlu0 %23 }
  0xa2   :  { %v25_v4 = vmul.f32 0.00390625, %v24_v3 }
  0xa4   :  { %27 = vst.msk [vmem:[%s85_s1] sm:$0xff] %vm26_vm0, %v25_v4 }
  0xa5   :  { %32 = vsyncpa [#allocation3], 1 }

</bundles_post_ra>
